<compile_context>
chip_gen: v5e
topology: v5e:2x2
jax: 0.10.0
libtpu: 0.0.40
codegen_flags: <defaults>
</compile_context>

<pallas_src>
import functools

import numpy as np
import jax
import jax.numpy as jnp
from jax import lax
from jax.experimental import pallas as pl
from jax.experimental.pallas import tpu as pltpu
from jax.scipy.ndimage import map_coordinates


# -----------------------------------------------------------------------------
# pltpu.roll direction probe (so the conv taps are never silently mirrored)
# -----------------------------------------------------------------------------
_ROLL_MATCHES_JNP = None  # None until _detect_roll_convention() runs


def _roll_probe_kernel(x_ref, o_ref):
    o_ref[...] = pltpu.roll(x_ref[...], shift=1, axis=1)


def _detect_roll_convention():
    """One-vreg probe that pins down pltpu.roll's rotation direction.  Must run
    eagerly (outside any jit trace) before the localization kernel is traced."""
    global _ROLL_MATCHES_JNP
    probe = jnp.broadcast_to(jnp.arange(128, dtype=jnp.float32)[None, :], (8, 128))
    out = pl.pallas_call(
        _roll_probe_kernel,
        out_shape=jax.ShapeDtypeStruct((8, 128), jnp.float32),
    )(probe)
    # jnp.roll convention: out[0, 0] == 127 ; opposite convention: out[0, 0] == 1
    _ROLL_MATCHES_JNP = bool(float(out[0, 0]) > 64.0)


def _shift_left(x, k, axis):
    """Cyclic left shift: result[..., j, ...] = x[..., (j + k) % n, ...]."""
    if _ROLL_MATCHES_JNP is None:
        raise RuntimeError(
            "_detect_roll_convention() must be called before kernel tracing")
    n = x.shape[axis]
    k = int(k) % n
    if k == 0:
        return x
    shift = (n - k) if _ROLL_MATCHES_JNP else k
    return pltpu.roll(x, shift=shift, axis=axis)


# -----------------------------------------------------------------------------
# Fused localization CNN: 5 x (Conv2d valid + MaxPool2d(2,2) + ReLU), one kernel.
# Layout (H, C, W) with W on lanes; stage s keeps its valid W samples at lane
# stride dil = 2**s, so pooling along W is a lane roll + max and no compaction
# is ever needed.  All dynamic indices are on leading (untiled) ref dimensions.
# -----------------------------------------------------------------------------
def _chunk_kh(K, Cin, target_rows=288):
    """Split the K kernel-height taps into contraction chunks of ~target_rows rows
    (each chunk >= one native MXU K-pass; bounds vreg pressure in hot stages)."""
    rows_per_tap = K * Cin
    taps = max(1, target_rows // rows_per_tap)
    chunks, kh0 = [], 0
    while kh0 < K:
        nk = min(taps, K - kh0)
        chunks.append((kh0, nk))
        kh0 += nk
    return tuple(chunks)


def _fused_loc_kernel(*refs, stages, W):
    """refs = (x, *weight_chunks, *biases, out, *rolled_scratch, *act_scratch)."""
    n_stages = len(stages)
    n_w = sum(len(st[6]) for st in stages)
    x_ref = refs[0]
    w_flat = refs[1:1 + n_w]
    b_refs = refs[1 + n_w:1 + n_w + n_stages]
    out_ref = refs[1 + n_w + n_stages]
    scratch = refs[2 + n_w + n_stages:]
    rolled_refs = scratch[:n_stages]
    act_refs = scratch[n_stages:]

    # split the flat per-chunk weight refs back per stage
    w_stage, pos = [], 0
    for st in stages:
        n_ch = len(st[6])
        w_stage.append(w_flat[pos:pos + n_ch])
        pos += n_ch

    for s in range(n_stages):
        K, Cin, Cout, H_in, PH, dil, chunks = stages[s]
        rolled = rolled_refs[s]
        last = s == n_stages - 1
        src = None if s == 0 else act_refs[s - 1]
        dst = out_ref if last else act_refs[s]
        w_chunks = w_stage[s]
        b_ref = b_refs[s]

        # -- Phase A: cache the K lane-rolled bf16 copies of every input row once --
        def roll_rows(h, carry, _K=K, _dil=dil, _src=src, _rolled=rolled,
                      _first=(s == 0)):
            if _first:
                slab = x_ref[0, h].astype(jnp.bfloat16)       # (Cin, W)
            else:
                slab = _src[h]                                # (Cin, W) bf16
            for kw in range(_K):
                _rolled[h * _K + kw] = _shift_left(slab, _dil * kw, axis=1)
            return carry

        lax.fori_loop(0, H_in, roll_rows, 0)

        # -- Phase B: per pooled row, deep bf16 matmuls with both conv rows batched
        #    on the lane axis (RHS = (rows, 2*W)); f32 accumulation on the MXU. --
        def pool_rows(p, carry, _K=K, _Cin=Cin, _dil=dil, _chunks=chunks,
                      _w=w_chunks, _b=b_ref, _rolled=rolled, _dst=dst, _last=last):
            r0 = 2 * p
            acc = None
            for j, (kh0, nkh) in enumerate(_chunks):
                taps = nkh * _K
                rows = taps * _Cin
                p0 = _rolled[pl.ds((r0 + kh0) * _K, taps)].reshape(rows, W)
                p1 = _rolled[pl.ds((r0 + 1 + kh0) * _K, taps)].reshape(rows, W)
                rhs = jnp.concatenate([p0, p1], axis=1)             # (rows, 2W) bf16
                part = jnp.dot(_w[j][...], rhs,
                               preferred_element_type=jnp.float32)  # (Cout, 2W)
                acc = part if acc is None else acc + part
            rm = jnp.maximum(acc[:, :W], acc[:, W:]) + _b[...]      # H-pool + bias
            pooled = jnp.maximum(rm, _shift_left(rm, _dil, axis=1))  # W-pool (lane)
            act = jnp.maximum(pooled, 0.0)                           # ReLU
            if _last:
                _dst[0, p] = act.astype(_dst.dtype)
            else:
                _dst[p] = act.astype(_dst.dtype)
            return carry

        lax.fori_loop(0, PH, pool_rows, 0)


def localization_pallas(x1_nchw, loc):
    """Runs the fused localization CNN; returns features in PyTorch NCHW-flatten
    order (matching x1.view(-1, len_loc))."""
    if _ROLL_MATCHES_JNP is None:
        raise RuntimeError(
            "_detect_roll_convention() must be called before tracing kernels")
    B, Cin0, H, W = x1_nchw.shape
    assert W % 128 == 0, "width must be lane-aligned"
    cfg = loc["cfg"]

    # pad the first-stage input channels to the packed (16-aligned) channel count
    cin_p = cfg[0][1]
    if cin_p != Cin0:
        x1_nchw = jnp.concatenate(
            [x1_nchw, jnp.zeros((B, cin_p - Cin0, H, W), x1_nchw.dtype)], axis=1)
    x_loc = jnp.transpose(x1_nchw, (0, 2, 1, 3))        # (B, H, Cin, W), W on lanes

    # per-stage plan (spatial sizes, lane dilation, pooled heights)
    stages = []
    h, vw, dil = H, W, 1
    for (K, Cin, Cout, chunks) in cfg:
        assert Cin % 16 == 0 and Cout % 16 == 0
        # rolled taps of valid samples must never wrap into valid output lanes
        assert (vw - 1) * dil < W, "lane-dilated conv would wrap into valid lanes"
        PH, PW = (h - K + 1) // 2, (vw - K + 1) // 2
        assert PH >= 1 and PW >= 1
        stages.append((K, Cin, Cout, h, PH, dil, chunks))
        h, vw, dil = PH, PW, dil * 2
    PH_L, C_L = stages[-1][4], stages[-1][2]

    w_flat = [w for ws in loc["w"] for w in ws]
    b_list = [jnp.broadcast_to(b, (b.shape[0], W)).astype(jnp.float32)
              for b in loc["b"]]

    flops = B * sum(2 * PH * Cout * (K * K * Cin) * (2 * W)
                    for (K, Cin, Cout, Hin, PH, d, ch) in stages)
    bytes_accessed = int(4 * x_loc.size + 4 * B * PH_L * C_L * W
                         + 2 * sum(int(w.size) for w in w_flat)
                         + 4 * sum(int(b.size) for b in b_list))

    scratch_shapes = (
        [pltpu.VMEM((Hin * K, Cin, W), jnp.bfloat16)             # rolled tap caches
         for (K, Cin, Cout, Hin, PH, d, ch) in stages]
        + [pltpu.VMEM((PH, Cout, W), jnp.bfloat16)               # inter-stage acts
           for (K, Cin, Cout, Hin, PH, d, ch) in stages[:-1]])

    out = pl.pallas_call(
        functools.partial(_fused_loc_kernel, stages=tuple(stages), W=W),
        out_shape=jax.ShapeDtypeStruct((B, PH_L, C_L, W), jnp.float32),
        grid=(B,),
        in_specs=([pl.BlockSpec((1, H, cin_p, W), lambda bi: (bi, 0, 0, 0))]
                  + [pl.BlockSpec(w.shape, lambda bi: (0, 0)) for w in w_flat]
                  + [pl.BlockSpec(bb.shape, lambda bi: (0, 0)) for bb in b_list]),
        out_specs=pl.BlockSpec((1, PH_L, C_L, W), lambda bi: (bi, 0, 0, 0)),
        scratch_shapes=scratch_shapes,
        compiler_params=pltpu.CompilerParams(
            dimension_semantics=("parallel",),
            vmem_limit_bytes=32 * 1024 * 1024),
        cost_estimate=pl.CostEstimate(flops=int(flops), transcendentals=0,
                                      bytes_accessed=bytes_accessed),
    )(x_loc, *w_flat, *b_list)

    feat = out[:, :, :, 0:dil * vw:dil]                  # (B, PH, C, PW) valid lanes
    return jnp.transpose(feat, (0, 2, 1, 3)).reshape(B, -1)


# -----------------------------------------------------------------------------
# affine_grid + grid_sample for translation-only theta (bilinear, zeros padding,
# align_corners=False) as separable resampling in the natural (N, C*H, W) layout:
# one column-resampling matmul batched over all channels, then per-channel row
# resampling with a stationary LHS.  No wrapper-side transpose of the data path.
# -----------------------------------------------------------------------------
def _sample_kernel(t_ref, x_ref, o_ref, *, C, H, W):
    n = pl.program_id(0)
    tx = t_ref[n, 0]               # translation along x (width),  normalized coords
    ty = t_ref[n, 1]               # translation along y (height), normalized coords
    sx = tx * (W * 0.5)            # source shift in input pixels (cols)
    sy = ty * (H * 0.5)            # source shift in input pixels (rows)

    iw = lax.broadcasted_iota(jnp.int32, (W, W), 0).astype(jnp.float32)  # in  col
    ow = lax.broadcasted_iota(jnp.int32, (W, W), 1).astype(jnp.float32)  # out col
    wx_t = jnp.maximum(0.0, 1.0 - jnp.abs(ow + sx - iw))                 # (Win, Wout)

    oh = lax.broadcasted_iota(jnp.int32, (H, H), 0).astype(jnp.float32)  # out row
    ih = lax.broadcasted_iota(jnp.int32, (H, H), 1).astype(jnp.float32)  # in  row
    wy = jnp.maximum(0.0, 1.0 - jnp.abs(oh + sy - ih))                   # (Hout, Hin)

    xw = jnp.dot(x_ref[0], wx_t, preferred_element_type=jnp.float32)     # (C*H, W)
    for c in range(C):
        o_ref[0, c * H:(c + 1) * H, :] = jnp.dot(
            wy, xw[c * H:(c + 1) * H, :],
            preferred_element_type=jnp.float32).astype(o_ref.dtype)


def grid_sample_translate(x_nchw, trans):
    # x_nchw: (N, C, H, W); trans: (N, 2) = (tx, ty) in normalized [-1, 1] units
    N, C, H, W = x_nchw.shape
    x_in = x_nchw.reshape(N, C * H, W)                   # pure reshape, no transpose
    flops = 2 * N * C * H * W * (H + W)
    bytes_accessed = int(4 * (2 * N * C * H * W + int(trans.size)))
    out = pl.pallas_call(
        functools.partial(_sample_kernel, C=C, H=H, W=W),
        out_shape=jax.ShapeDtypeStruct((N, C * H, W), jnp.float32),
        grid=(N,),
        in_specs=[
            pl.BlockSpec(memory_space=pltpu.MemorySpace.SMEM),   # translations
            pl.BlockSpec((1, C * H, W), lambda i: (i, 0, 0)),
        ],
        out_specs=pl.BlockSpec((1, C * H, W), lambda i: (i, 0, 0)),
        compiler_params=pltpu.CompilerParams(dimension_semantics=("parallel",)),
        cost_estimate=pl.CostEstimate(flops=flops, transcendentals=0,
                                      bytes_accessed=bytes_accessed),
    )(trans, x_in)
    return out.reshape(N, C, H, W)


# -----------------------------------------------------------------------------
# Parameters (deterministic, in-script; shapes follow STNv2b.__init__)
# -----------------------------------------------------------------------------
def init_params(key, img_channels, img_layers, nf1, nf2, img_resolution):
    assert nf1 % 16 == 0, "nf1 must be a multiple of 16 (bf16 sublane tile)"
    cin = img_channels * img_layers
    conv_defs = [(cin, nf1, 7), (nf1, nf1 * 2, 5), (nf1 * 2, nf1 * 4, 3),
                 (nf1 * 4, nf1 * 6, 3), (nf1 * 6, nf1 * 8, 3)]
    keys = jax.random.split(key, 2 * len(conv_defs) + 1)
    cfg, w_chunks, biases, conv_ref = [], [], [], []
    h = img_resolution
    for idx, (ci, co, k) in enumerate(conv_defs):
        w_hwio = jax.random.normal(keys[2 * idx], (k, k, ci, co),
                                   jnp.float32) / np.sqrt(ci * k * k)
        bias = 0.01 * jax.random.normal(keys[2 * idx + 1], (co,), jnp.float32)
        conv_ref.append((w_hwio, bias))
        # pad Cin to a multiple of 16 so every bf16 slab is native-tile aligned
        ci_p = int(-(-ci // 16) * 16)
        if ci_p != ci:
            w_hwio_p = jnp.concatenate(
                [w_hwio, jnp.zeros((k, k, ci_p - ci, co), jnp.float32)], axis=2)
        else:
            w_hwio_p = w_hwio
        # rows ordered (kh, kw, ci) to match the rolled-tap-cache patch order
        w_full = jnp.transpose(w_hwio_p.reshape(k * k * ci_p, co), (1, 0))  # (Cout,R)
        chunks = _chunk_kh(k, ci_p)
        w_chunks.append(tuple(
            w_full[:, kh0 * k * ci_p:(kh0 + nkh) * k * ci_p].astype(jnp.bfloat16)
            for (kh0, nkh) in chunks))
        biases.append(bias.reshape(co, 1))
        cfg.append((k, ci_p, co, chunks))
        h = (h - k + 1) // 2
    len_loc = h * h * conv_defs[-1][1]
    w1 = jax.random.normal(keys[-1], (len_loc, nf2), jnp.float32) / np.sqrt(len_loc)
    b1 = jnp.zeros((nf2,), jnp.float32)
    # fc_loc[2] is zero-initialized in the PyTorch module:
    w2 = jnp.zeros((nf2, img_layers * 2), jnp.float32)
    b2 = jnp.zeros((img_layers * 2,), jnp.float32)
    return {"loc": {"cfg": tuple(cfg), "w": tuple(w_chunks), "b": tuple(biases)},
            "conv_ref": conv_ref, "w1": w1, "b1": b1, "w2": w2, "b2": b2}


# -----------------------------------------------------------------------------
# Full forward pass
# -----------------------------------------------------------------------------
def stn_v2b_forward(x, params):
    # x: (B, L, C, H, W) float32
    B, L, C, H, W = x.shape
    x1 = x.reshape(B, L * C, H, W)
    feat = localization_pallas(x1, params["loc"])

    # fc_loc: Linear -> ReLU -> Linear (tiny; plain XLA, fused by the compiler)
    hdn = jnp.maximum(jnp.dot(feat, params["w1"]) + params["b1"], 0.0)
    translation = (jnp.dot(hdn, params["w2"]) + params["b2"]).reshape(B, L, 2)

    # convert_translate_to_2x3: theta = [[1, 0, tx], [0, 1, ty]]
    ones = jnp.ones((B, L), jnp.float32)
    zeros = jnp.zeros((B, L), jnp.float32)
    theta = jnp.stack([jnp.stack([ones, zeros, translation[..., 0]], axis=-1),
                       jnp.stack([zeros, ones, translation[..., 1]], axis=-1)],
                      axis=-2)                                   # (B, L, 2, 3)

    out = grid_sample_translate(x.reshape(B * L, C, H, W),       # affine_grid +
                                translation.reshape(B * L, 2))   # grid_sample
    return out.reshape(B, L, C, H, W), theta


# -----------------------------------------------------------------------------
# Pure-XLA references used only for in-script validation
# -----------------------------------------------------------------------------
def localization_ref(x1_nchw, conv_ref):
    """bf16-simulating reference (bf16 conv inputs/weights, f32 accumulation,
    bf16 inter-stage activations), mirroring the kernel's precision choices."""
    y = x1_nchw
    n = len(conv_ref)
    for idx, (w_hwio, bias) in enumerate(conv_ref):
        w_oihw = jnp.transpose(w_hwio, (3, 2, 0, 1))
        y = lax.conv_general_dilated(
            y.astype(jnp.bfloat16), w_oihw.astype(jnp.bfloat16), (1, 1), "VALID",
            dimension_numbers=("NCHW", "OIHW", "NCHW"),
            preferred_element_type=jnp.float32)
        y = y + bias[None, :, None, None]
        y = lax.reduce_window(y, -np.inf, lax.max, (1, 1, 2, 2), (1, 1, 2, 2),
                              "VALID")
        y = jnp.maximum(y, 0.0)
        if idx < n - 1:
            y = y.astype(jnp.bfloat16).astype(jnp.float32)
    return y.reshape(y.shape[0], -1)


def _grid_sample_ref(img_chw, tx, ty):
    """Independent bilinear + zeros-padding reference (== F.grid_sample for
    translation-only theta, align_corners=False)."""
    C, H, W = img_chw.shape
    rows = jnp.arange(H, dtype=jnp.float32)[:, None] + ty * (H * 0.5)
    cols = jnp.arange(W, dtype=jnp.float32)[None, :] + tx * (W * 0.5)
    coords = [jnp.broadcast_to(rows, (H, W)), jnp.broadcast_to(cols, (H, W))]
    return jnp.stack([map_coordinates(img_chw[c], coords, order=1,
                                      mode="constant", cval=0.0)
                      for c in range(C)])


if __name__ == "__main__":
    # Small config consistent with the module: resolution must survive the
    # 5 conv/pool stages (128 -> 61 -> 28 -> 13 -> 5 -> 1 spatially).
    B, L, C, R = 2, 2, 4, 128
    nf1, nf2 = 16, 32

    _detect_roll_convention()   # pin pltpu.roll direction before any tracing

    key = jax.random.PRNGKey(0)
    kx, kp = jax.random.split(key)
    x = jax.random.normal(kx, (B, L, C, R, R), jnp.float32)
    params = init_params(kp, C, L, nf1, nf2, R)

    fwd = jax.jit(lambda inp: stn_v2b_forward(inp, params))
    out, theta = fwd(x)
    jax.block_until_ready((out, theta))

    assert out.shape == (B, L, C, R, R), out.shape
    assert theta.shape == (B, L, 2, 3), theta.shape

    # fc_loc[2] is zero-initialized (as in the module) -> identity translation,
    # so theta is the identity 2x3 and grid_sample must reproduce the input.
    expected_theta = np.tile(np.array([[1.0, 0.0, 0.0], [0.0, 1.0, 0.0]],
                                      np.float32), (B, L, 1, 1))
    np.testing.assert_allclose(np.asarray(theta), expected_theta, atol=1e-6)
    np.testing.assert_allclose(np.asarray(out), np.asarray(x), atol=1e-3, rtol=1e-3)

    # Check 1: fused localization CNN vs bf16-simulating XLA conv/pool reference.
    x1 = x.reshape(B, L * C, R, R)
    feat_pallas = np.asarray(
        jax.jit(lambda a: localization_pallas(a, params["loc"]))(x1))
    feat_ref = np.asarray(localization_ref(x1, params["conv_ref"]))
    np.testing.assert_allclose(feat_pallas, feat_ref, rtol=2e-2, atol=2e-2)

    # Check 2: grid_sample kernel vs independent bilinear reference for nonzero,
    # fractional and out-of-range translations (exercises zeros padding).
    t_test = jnp.array([[0.35, -0.6], [1.3, 0.07], [-0.15, 0.8], [0.02, -1.7]],
                       jnp.float32)
    x_test = x.reshape(B * L, C, R, R)
    samp = np.asarray(jax.block_until_ready(
        jax.jit(grid_sample_translate)(x_test, t_test)))
    for nidx in range(B * L):
        ref_n = _grid_sample_ref(x_test[nidx], float(t_test[nidx, 0]),
                                 float(t_test[nidx, 1]))
        np.testing.assert_allclose(samp[nidx], np.asarray(ref_n),
                                   rtol=2e-3, atol=2e-3)

    print("KERNEL_OK")
</pallas_src>

<mosaic_0001>
module attributes {stable_mosaic.version = 11 : i64} {
  func.func @_roll_probe_kernel(%arg0: memref<8x128xf32, #tpu.memory_space<vmem>>, %arg1: memref<8x128xf32, #tpu.memory_space<vmem>>) attributes {dimension_semantics = [], scalar_prefetch = 0 : i64, scratch_operands = 0 : i64, tpu.core_type = #tpu.core_type<tc>} {
    %c0 = arith.constant 0 : index
    %c0_0 = arith.constant 0 : index
    %0 = vector.load %arg0[%c0, %c0_0] : memref<8x128xf32, #tpu.memory_space<vmem>>, vector<8x128xf32>
    %c1_i32 = arith.constant 1 : i32
    %1 = tpu.dynamic_rotate %0 by %c1_i32 dim 1 : vector<8x128xf32>, i32 -> vector<8x128xf32>
    %c0_1 = arith.constant 0 : index
    %c0_2 = arith.constant 0 : index
    %2 = vector.load %arg1[%c0_1, %c0_2] : memref<8x128xf32, #tpu.memory_space<vmem>>, vector<8x128xf32>
    tpu.vector_store %arg1[%c0_1, %c0_2], %1 {strides = array<i32>} : memref<8x128xf32, #tpu.memory_space<vmem>>, vector<8x128xf32>,
    return
  }
}

</mosaic_0001>

<bundles_post_ra>
// kernel: tpu_custom_call.1
= control target key start
LH: loop header
LB: loop body
LE: loop exit
PB: predicated region body
PF: predicated region fallthrough
CT: control target
= control target key end

     0   :  { %6 = vsyncpa [#allocation3], 0  ;;  %s118_s0 = inlined_call_operand.hbm [shape: f32[8,128], index: 0, kind: input, shape index: {}]   ;;  %s119_s1 = inlined_call_operand.hbm [shape: f32[8,128], index: 1, kind: output, shape index: {}]  }
   0x1   :  { %7 = vsyncpa [#allocation4], 0  ;;  %s13_s8 = sshll.u32 %s118_s0, 4  ;;  %s99_s9 = smov [#allocation2]   ;;  %s14_s8 = int_to_ptr.hbm [resolvable:$true] %s13_s8 }
   0x2   :  { %s15_s10 = sshll.u32 %s99_s9, 4  ;;  %s16_s10 = int_to_ptr.vmem [resolvable:$true] %s15_s10 }
   0x3   :  { %18 = dma.hbm_to_vmem [thread:$0]  %s14_s8, 128, %s16_s10, [#allocation3]  }
   0x4   :  { %95 = dma.done.wait [#allocation3], 128  }
   0x5   :  { %96 = vsyncadd [#allocation3], 4294967168  ;;  %v23_v0 = vld [vmem:[#allocation2] sm:$0xff]  ;;  %s100_s11 = smov 1   ;;  %s101_s12 = smov [#allocation5]  }
   0x6   :  { %24 = vrot.lane.b32.xlu0 %v23_v0, %s100_s11  ;;  %s32_s13 = sshll.u32 %s101_s12, 4  ;;  %s34_s16 = sshll.u32 %s119_s1, 4  ;;  %s33_s13 = int_to_ptr.vmem [resolvable:$true] %s32_s13  ;;  %s35_s16 = int_to_ptr.hbm [resolvable:$true] %s34_s16 }
  0x78   :  { %v25_v1 = vpop.permute.xlu0 %24 }
  0x79   :  { %26 = vst [vmem:[#allocation5] sm:$0xff] %v25_v1 }
  0x7a   :  { %37 = dma.vmem_to_hbm [thread:$0]  %s33_s13, 128, %s35_s16, [#allocation4]  }
  0x7b   :  { %97 = dma.done.wait [#allocation4], 128  }
  0x7c   :  { %98 = vsyncadd [#allocation4], 4294967168 }
  0x7d   :  { %42 = vsyncpa [#allocation3], 1 }
  0x7e   :  { %43 = vsyncpa [#allocation4], 1 }

</bundles_post_ra>
